<compile_context>
chip_gen: v7x
topology: tpu7x:2x2x1
jax: 0.10.0
libtpu: 0.0.40
codegen_flags: <defaults>
</compile_context>

<pallas_src>
import functools

import jax
import jax.numpy as jnp
from jax.experimental import pallas as pl
from jax.experimental.pallas import tpu as pltpu

_SUBLANE = 8   # f32 sublane count


def _round_up(x, m):
    return (x + m - 1) // m * m


def _fcc_mlp_kernel(x_ref, w1_ref, b1_ref, w2_ref, b2_ref, w3_ref, b3_ref, out_ref):
    """3-layer MLP on one batch tile; weights/biases resident in VMEM.

    Matmul inputs are bf16 (native MXU rate on v5e/v6e/v7x); accumulation,
    bias-add and ReLU are f32.
    """
    x = x_ref[...].astype(jnp.bfloat16)
    # layer 1: [tm, nc] @ [nc, H] + [1, H], ReLU   (K = nc is a tiny dot; fine)
    h = jnp.dot(x, w1_ref[...], preferred_element_type=jnp.float32) + b1_ref[...]
    h = jnp.maximum(h, 0.0)
    # layer 2: [tm, H] @ [H, H] + [1, H], ReLU
    h = jnp.dot(h.astype(jnp.bfloat16), w2_ref[...],
                preferred_element_type=jnp.float32) + b2_ref[...]
    h = jnp.maximum(h, 0.0)
    # layer 3 (no activation): [tm, H] @ [H, 2*nc] + [1, 2*nc]
    out_ref[...] = (
        jnp.dot(h.astype(jnp.bfloat16), w3_ref[...],
                preferred_element_type=jnp.float32)
        + b3_ref[...]
    )


def prepare_fcc_params(params):
    """One-time weight prep (hoisted out of the forward path).

    Casts matmul weights to bf16 and biases to f32 row vectors.  Call once and
    reuse; the per-forward work is then just the pallas_call.
    """
    bf16, f32 = jnp.bfloat16, jnp.float32
    return {
        "w1": jnp.asarray(params["w1"], bf16),
        "b1": jnp.asarray(params["b1"], f32).reshape(1, -1),
        "w2": jnp.asarray(params["w2"], bf16),
        "b2": jnp.asarray(params["b2"], f32).reshape(1, -1),
        "w3": jnp.asarray(params["w3"], bf16),
        "b3": jnp.asarray(params["b3"], f32).reshape(1, -1),
    }


@functools.partial(jax.jit, static_argnames=("tm",))
def fcc_forward(value, prep, *, tm=None):
    """Pallas-backed FCC.forward.

    value: [B, nc] float32
    prep:  output of `prepare_fcc_params` (bf16 weights, f32 biases)
    returns (translation [B, nc], scale [B, nc]), float32
    """
    f32 = jnp.float32
    B, nc = value.shape
    H = prep["w1"].shape[1]
    out_dim = prep["w3"].shape[1]          # 2 * nc

    # Batch tiling: pad batch only up to the sublane multiple (never up to a
    # big tile at tiny B); target >= 4 grid steps so v7x's 2 TensorCores both
    # get work, cap tiles at 512 rows for the mem-bound large-batch regime.
    B8 = _round_up(max(B, _SUBLANE), _SUBLANE)
    if tm is None:
        tm = min(512, max(_SUBLANE, _round_up(-(-B8 // 4), _SUBLANE)))
    B_pad = _round_up(B8, tm)

    x = value.astype(f32)
    if B_pad != B:
        # tiny: nc columns only (8 B/row), no 128-lane padding in HBM
        x = jnp.zeros((B_pad, nc), f32).at[:B, :].set(x)

    grid = (B_pad // tm,)
    const = lambda i: (0, 0)               # weights/biases stay resident in VMEM
    # TODO(synk): if H is ever scaled to multi-thousand sizes, mark these
    # constant blocks pipeline_mode=pl.Buffered(1) and tile layer-2 over its K
    # axis to stay inside v7x's 64 MiB VMEM; irrelevant at H=128 (~100 KiB).
    in_specs = [
        pl.BlockSpec((tm, nc), lambda i: (i, 0)),   # x: tiled over batch rows
        pl.BlockSpec((nc, H), const),
        pl.BlockSpec((1, H), const),
        pl.BlockSpec((H, H), const),
        pl.BlockSpec((1, H), const),
        pl.BlockSpec((H, out_dim), const),
        pl.BlockSpec((1, out_dim), const),
    ]
    out_specs = pl.BlockSpec((tm, out_dim), lambda i: (i, 0))

    flops = 2 * B_pad * (nc * H + H * H + H * out_dim)
    bytes_accessed = (
        B_pad * nc * 4                                                # x (f32)
        + (prep["w1"].size + prep["w2"].size + prep["w3"].size) * 2   # bf16 weights
        + (prep["b1"].size + prep["b2"].size + prep["b3"].size) * 4   # f32 biases
        + B_pad * out_dim * 4                                         # output (f32)
    )

    pars_pad = pl.pallas_call(
        _fcc_mlp_kernel,
        out_shape=jax.ShapeDtypeStruct((B_pad, out_dim), f32),
        grid=grid,
        in_specs=in_specs,
        out_specs=out_specs,
        compiler_params=pltpu.CompilerParams(
            dimension_semantics=("parallel",),   # v7x: shard batch tiles over 2 TCs
        ),
        cost_estimate=pl.CostEstimate(
            flops=flops, transcendentals=0, bytes_accessed=bytes_accessed),
    )(x, prep["w1"], prep["b1"], prep["w2"], prep["b2"], prep["w3"], prep["b3"])

    pars = pars_pad[:B]
    return pars[:, :nc], pars[:, nc:]


def init_fcc_params(key, nc, n_hidden=128):
    """Deterministic synthetic init matching nn.Linear shapes (stored transposed:
    y = x @ W + b, so W is [in, out])."""
    ks = jax.random.split(key, 6)
    s1 = 1.0 / jnp.sqrt(float(nc))
    sh = 1.0 / jnp.sqrt(float(n_hidden))
    return {
        "w1": jax.random.uniform(ks[0], (nc, n_hidden), jnp.float32, -s1, s1),
        "b1": jax.random.uniform(ks[1], (1, n_hidden), jnp.float32, -s1, s1),
        "w2": jax.random.uniform(ks[2], (n_hidden, n_hidden), jnp.float32, -sh, sh),
        "b2": jax.random.uniform(ks[3], (1, n_hidden), jnp.float32, -sh, sh),
        "w3": jax.random.uniform(ks[4], (n_hidden, 2 * nc), jnp.float32, -sh, sh),
        "b3": jax.random.uniform(ks[5], (1, 2 * nc), jnp.float32, -sh, sh),
    }


def _reference_forward(value, params, nc):
    """Plain-JAX reference using the same bf16-input / f32-accumulate recipe.

    Note: bf16 matmul inputs deviate from a strict-f32 PyTorch forward by
    ~1e-3 relative error; the self-test tolerance below documents this.
    """
    bf16 = jnp.bfloat16
    h = jnp.dot(value.astype(bf16), params["w1"].astype(bf16),
                preferred_element_type=jnp.float32) + params["b1"]
    h = jnp.maximum(h, 0.0)
    h = jnp.dot(h.astype(bf16), params["w2"].astype(bf16),
                preferred_element_type=jnp.float32) + params["b2"]
    h = jnp.maximum(h, 0.0)
    pars = jnp.dot(h.astype(bf16), params["w3"].astype(bf16),
                   preferred_element_type=jnp.float32) + params["b3"]
    return pars[:, :nc], pars[:, nc:]


if __name__ == "__main__":
    nc = 2
    n_hidden = 128
    B = 2   # module example uses value = ones([1, 2]); use a small batch of 2

    key = jax.random.PRNGKey(0)
    params = init_fcc_params(key, nc, n_hidden)
    prep = prepare_fcc_params(params)        # one-time weight prep (hoisted)

    # deterministic input, matching the module's `value` convention [B, nc]
    value = jnp.ones((B, nc), dtype=jnp.float32)

    translation, scale = fcc_forward(value, prep)
    jax.block_until_ready((translation, scale))

    t_ref, s_ref = _reference_forward(value, params, nc)
    assert translation.shape == (B, nc) and scale.shape == (B, nc)
    assert jnp.allclose(translation, t_ref, atol=2e-3, rtol=2e-3)
    assert jnp.allclose(scale, s_ref, atol=2e-3, rtol=2e-3)

    print("KERNEL_OK")
</pallas_src>

<mosaic_0001>
module attributes {stable_mosaic.version = 11 : i64} {
  func.func @_fcc_mlp_kernel(%arg0: i32, %arg1: memref<8x2xf32, #tpu.memory_space<vmem>>, %arg2: memref<2x128xbf16, #tpu.memory_space<vmem>>, %arg3: memref<1x128xf32, #tpu.memory_space<vmem>>, %arg4: memref<128x128xbf16, #tpu.memory_space<vmem>>, %arg5: memref<1x128xf32, #tpu.memory_space<vmem>>, %arg6: memref<128x4xbf16, #tpu.memory_space<vmem>>, %arg7: memref<1x4xf32, #tpu.memory_space<vmem>>, %arg8: memref<8x4xf32, #tpu.memory_space<vmem>>) attributes {dimension_semantics = [#tpu.dimension_semantics<parallel>], iteration_bounds = array<i64: 1>, scalar_prefetch = 0 : i64, scratch_operands = 0 : i64, tpu.core_type = #tpu.core_type<tc>, window_params = [{transform_indices = @transform_0, window_bounds = array<i64: 8, 2>}, {pipeline_mode = #tpu.pipeline_mode<synchronous>, transform_indices = @transform_1, window_bounds = array<i64: 2, 128>}, {pipeline_mode = #tpu.pipeline_mode<synchronous>, transform_indices = @transform_2, window_bounds = array<i64: 1, 128>}, {pipeline_mode = #tpu.pipeline_mode<synchronous>, transform_indices = @transform_3, window_bounds = array<i64: 128, 128>}, {pipeline_mode = #tpu.pipeline_mode<synchronous>, transform_indices = @transform_4, window_bounds = array<i64: 1, 128>}, {pipeline_mode = #tpu.pipeline_mode<synchronous>, transform_indices = @transform_5, window_bounds = array<i64: 128, 4>}, {pipeline_mode = #tpu.pipeline_mode<synchronous>, transform_indices = @transform_6, window_bounds = array<i64: 1, 4>}, {transform_indices = @transform_7, window_bounds = array<i64: 8, 4>}]} {
    %c0 = arith.constant 0 : index
    %c0_0 = arith.constant 0 : index
    %0 = vector.load %arg1[%c0, %c0_0] : memref<8x2xf32, #tpu.memory_space<vmem>>, vector<8x2xf32>
    %1 = arith.truncf %0 : vector<8x2xf32> to vector<8x2xbf16>
    %c0_1 = arith.constant 0 : index
    %c0_2 = arith.constant 0 : index
    %2 = vector.load %arg2[%c0_1, %c0_2] : memref<2x128xbf16, #tpu.memory_space<vmem>>, vector<2x128xbf16>
    %cst = arith.constant dense<0.000000e+00> : vector<8x128xf32>
    %3 = tpu.matmul %1, %2, %cst {dimension_numbers = #tpu.dot_dimension_numbers<[1], [0], [0], [1], [0, 0, 1, 1], [], []>} : vector<8x2xbf16>, vector<2x128xbf16>, vector<8x128xf32> -> vector<8x128xf32>
    %c0_3 = arith.constant 0 : index
    %c0_4 = arith.constant 0 : index
    %4 = vector.load %arg3[%c0_3, %c0_4] : memref<1x128xf32, #tpu.memory_space<vmem>>, vector<1x128xf32>
    %5 = vector.broadcast %4 : vector<1x128xf32> to vector<8x128xf32>
    %6 = arith.addf %3, %5 : vector<8x128xf32>
    %cst_5 = arith.constant 0.000000e+00 : f32
    %7 = vector.broadcast %cst_5 : f32 to vector<8x128xf32>
    %8 = arith.maximumf %6, %7 : vector<8x128xf32>
    %9 = arith.truncf %8 : vector<8x128xf32> to vector<8x128xbf16>
    %c0_6 = arith.constant 0 : index
    %c0_7 = arith.constant 0 : index
    %10 = vector.load %arg4[%c0_6, %c0_7] : memref<128x128xbf16, #tpu.memory_space<vmem>>, vector<128x128xbf16>
    %cst_8 = arith.constant dense<0.000000e+00> : vector<8x128xf32>
    %11 = tpu.matmul %9, %10, %cst_8 {dimension_numbers = #tpu.dot_dimension_numbers<[1], [0], [0], [1], [0, 0, 1, 1], [], []>} : vector<8x128xbf16>, vector<128x128xbf16>, vector<8x128xf32> -> vector<8x128xf32>
    %c0_9 = arith.constant 0 : index
    %c0_10 = arith.constant 0 : index
    %12 = vector.load %arg5[%c0_9, %c0_10] : memref<1x128xf32, #tpu.memory_space<vmem>>, vector<1x128xf32>
    %13 = vector.broadcast %12 : vector<1x128xf32> to vector<8x128xf32>
    %14 = arith.addf %11, %13 : vector<8x128xf32>
    %cst_11 = arith.constant 0.000000e+00 : f32
    %15 = vector.broadcast %cst_11 : f32 to vector<8x128xf32>
    %16 = arith.maximumf %14, %15 : vector<8x128xf32>
    %17 = arith.truncf %16 : vector<8x128xf32> to vector<8x128xbf16>
    %c0_12 = arith.constant 0 : index
    %c0_13 = arith.constant 0 : index
    %18 = vector.load %arg6[%c0_12, %c0_13] : memref<128x4xbf16, #tpu.memory_space<vmem>>, vector<128x4xbf16>
    %cst_14 = arith.constant dense<0.000000e+00> : vector<8x4xf32>
    %19 = tpu.matmul %17, %18, %cst_14 {dimension_numbers = #tpu.dot_dimension_numbers<[1], [0], [0], [1], [0, 0, 1, 1], [], []>} : vector<8x128xbf16>, vector<128x4xbf16>, vector<8x4xf32> -> vector<8x4xf32>
    %c0_15 = arith.constant 0 : index
    %c0_16 = arith.constant 0 : index
    %20 = vector.load %arg7[%c0_15, %c0_16] : memref<1x4xf32, #tpu.memory_space<vmem>>, vector<1x4xf32>
    %21 = vector.broadcast %20 : vector<1x4xf32> to vector<8x4xf32>
    %22 = arith.addf %19, %21 : vector<8x4xf32>
    %c0_17 = arith.constant 0 : index
    %c0_18 = arith.constant 0 : index
    %23 = vector.load %arg8[%c0_17, %c0_18] : memref<8x4xf32, #tpu.memory_space<vmem>>, vector<8x4xf32>
    tpu.vector_store %arg8[%c0_17, %c0_18], %22 {strides = array<i32>} : memref<8x4xf32, #tpu.memory_space<vmem>>, vector<8x4xf32>,
    return
  }
  func.func @transform_0(%arg0: i32) -> (i32, i32) {
    %c0_i32 = arith.constant 0 : i32
    %c0_i32_0 = arith.constant 0 : i32
    return %arg0, %c0_i32 : i32, i32
  }
  func.func @transform_1(%arg0: i32) -> (i32, i32) {
    %c0_i32 = arith.constant 0 : i32
    %c0_i32_0 = arith.constant 0 : i32
    %c0_i32_1 = arith.constant 0 : i32
    return %c0_i32, %c0_i32_0 : i32, i32
  }
  func.func @transform_2(%arg0: i32) -> (i32, i32) {
    %c0_i32 = arith.constant 0 : i32
    %c0_i32_0 = arith.constant 0 : i32
    %c0_i32_1 = arith.constant 0 : i32
    return %c0_i32, %c0_i32_0 : i32, i32
  }
  func.func @transform_3(%arg0: i32) -> (i32, i32) {
    %c0_i32 = arith.constant 0 : i32
    %c0_i32_0 = arith.constant 0 : i32
    %c0_i32_1 = arith.constant 0 : i32
    return %c0_i32, %c0_i32_0 : i32, i32
  }
  func.func @transform_4(%arg0: i32) -> (i32, i32) {
    %c0_i32 = arith.constant 0 : i32
    %c0_i32_0 = arith.constant 0 : i32
    %c0_i32_1 = arith.constant 0 : i32
    return %c0_i32, %c0_i32_0 : i32, i32
  }
  func.func @transform_5(%arg0: i32) -> (i32, i32) {
    %c0_i32 = arith.constant 0 : i32
    %c0_i32_0 = arith.constant 0 : i32
    %c0_i32_1 = arith.constant 0 : i32
    return %c0_i32, %c0_i32_0 : i32, i32
  }
  func.func @transform_6(%arg0: i32) -> (i32, i32) {
    %c0_i32 = arith.constant 0 : i32
    %c0_i32_0 = arith.constant 0 : i32
    %c0_i32_1 = arith.constant 0 : i32
    return %c0_i32, %c0_i32_0 : i32, i32
  }
  func.func @transform_7(%arg0: i32) -> (i32, i32) {
    %c0_i32 = arith.constant 0 : i32
    %c0_i32_0 = arith.constant 0 : i32
    return %arg0, %c0_i32 : i32, i32
  }
}

</mosaic_0001>

<bundles_post_ra>
// kernel: fcc_forward.1
= control target key start
LH: loop header
LB: loop body
LE: loop exit
PB: predicated region body
PF: predicated region fallthrough
CT: control target
= control target key end

     0   :  { %vm41_vm0 = vcmask 1040384   ;;  %v421_v0 = vmov 0.0   ;;  %vm422_vm1 = vmmov 0   ;;  %vm37_vm2 = vcmask 15360   ;;  %s552_s1 = inlined_call_operand.vmem [shape: bf16[2,128], index: 1, kind: input, shape index: {}]   ;;  %s553_s0 = inlined_call_operand.vmem [shape: f32[8,2], index: 0, kind: input, shape index: {}]   ;;  %s554_s3 = inlined_call_operand.vmem [shape: bf16[128,128], index: 3, kind: input, shape index: {}]   ;;  %s555_s5 = inlined_call_operand.vmem [shape: bf16[128,4], index: 5, kind: input, shape index: {}]   ;;  %s556_s2 = inlined_call_operand.vmem [shape: f32[1,128], index: 2, kind: input, shape index: {}]   ;;  %s557_s4 = inlined_call_operand.vmem [shape: f32[1,128], index: 4, kind: input, shape index: {}]   ;;  %s558_s6 = inlined_call_operand.vmem [shape: f32[1,4], index: 6, kind: input, shape index: {}]   ;;  %s559_s7 = inlined_call_operand.vmem [shape: f32[8,4], index: 7, kind: output, shape index: {}]  }
   0x1   :  { %357 = vmatprep.subr.bf16.mxu0 %v421_v0  ;;  %v29_v1 = vld [vmem:[%s552_s1] sm:$0x1]  ;;  %359 = vmatprep.mubr.msk.bf16.mxu0 %vm422_vm1, %v421_v0  ;;  %v406_v6 = vld [vmem:[%s554_s3 + $0x8] sm:$0xff]   ;;  %v407_v7 = vld [vmem:[%s554_s3 + $0x10] sm:$0xff]   ;;  %vm311_vm3 = vcmask 31744  }
   0x2   :  { %v27_v2 = vld [vmem:[%s553_s0] sm:$0xff]  ;;  %v43_v3 = vsel %vm41_vm0, %v29_v1, 0  ;;  %363 = vmatprep.subr.bf16.mxu1 %v421_v0  ;;  %379 = vmatprep.mubr.msk.bf16.mxu1 %vm422_vm1, %v421_v0  ;;  %v408_v8 = vld [vmem:[%s554_s3 + $0x18] sm:$0xff]   ;;  %v410_v10 = vld [vmem:[%s554_s3 + $0x28] sm:$0xff]  }
   0x3   :  { %v28_v4 = vpack.c.bf16 %v27_v2, %v27_v2  ;;  %v405_v5 = vld [vmem:[%s554_s3] sm:$0xff]   ;;  %358 = vmatpush3.bf16.msra.mxu0 %v43_v3  ;;  %v411_v11 = vld [vmem:[%s554_s3 + $0x30] sm:$0xff]   ;;  %v412_v12 = vld [vmem:[%s554_s3 + $0x38] sm:$0xff]  }
   0x4   :  { %364 = vmatpush3.bf16.msra.mxu1 %v405_v5  ;;  %383 = vmatprep.subr.bf16.mxu0 %v421_v0  ;;  %v409_v9 = vld [vmem:[%s554_s3 + $0x20] sm:$0xff]   ;;  %v414_v14 = vld [vmem:[%s555_s5 + $0x8] sm:$0xff]   ;;  %v415_v15 = vld [vmem:[%s555_s5 + $0x10] sm:$0xff]  }
   0x5   :  { %365 = vmatprep.subr.bf16.mxu1 %v421_v0  ;;  %v413_v13 = vld [vmem:[%s555_s5] sm:$0xff]   ;;  %v416_v16 = vld [vmem:[%s555_s5 + $0x18] sm:$0xff]   ;;  %v418_v18 = vld [vmem:[%s555_s5 + $0x28] sm:$0xff]  }
   0x6   :  { %360 = vmatmul.mubr.msk.bf16.vlgmr.msra.gmra.mrb[0].mxu0 %vm37_vm2, %v28_v4  ;;  %v417_v17 = vld [vmem:[%s555_s5 + $0x20] sm:$0xff]   ;;  %v419_v27 = vld [vmem:[%s555_s5 + $0x30] sm:$0xff]   ;;  %v420_v28 = vld [vmem:[%s555_s5 + $0x38] sm:$0xff]  }
   0x7   :  { %399 = vmatprep.mubr.msk.bf16.mxu0 %vm422_vm1, %v421_v0  ;;  %384 = vmatpush3.bf16.msra.mxu0 %v413_v13  ;;  %v317_v19 = vld [vmem:[%s556_s2] ss:$0 sm:$0xff] }
   0x8   :  { %366 = vmatpush3.bf16.msra.mxu1 %v406_v6  ;;  %385 = vmatprep.subr.bf16.mxu0 %v421_v0  ;;  %v319_v29 = vld [vmem:[%s557_s4] ss:$0 sm:$0xff] }
   0x9   :  { %367 = vmatprep.subr.bf16.mxu1 %v421_v0  ;;  %v328_v37 = vld [vmem:[%s558_s6] ss:$0 sm:$0xff] }
   0xb   :  { %386 = vmatpush3.bf16.msra.mxu0 %v414_v14 }
   0xc   :  { %368 = vmatpush3.bf16.msra.mxu1 %v407_v7  ;;  %387 = vmatprep.subr.bf16.mxu0 %v421_v0 }
   0xd   :  { %369 = vmatprep.subr.bf16.mxu1 %v421_v0 }
   0xf   :  { %388 = vmatpush3.bf16.msra.mxu0 %v415_v15 }
  0x10   :  { %370 = vmatpush3.bf16.msra.mxu1 %v408_v8  ;;  %389 = vmatprep.subr.bf16.mxu0 %v421_v0 }
  0x11   :  { %371 = vmatprep.subr.bf16.mxu1 %v421_v0 }
  0x13   :  { %390 = vmatpush3.bf16.msra.mxu0 %v416_v16 }
  0x14   :  { %372 = vmatpush3.bf16.msra.mxu1 %v409_v9  ;;  %391 = vmatprep.subr.bf16.mxu0 %v421_v0 }
  0x15   :  { %373 = vmatprep.subr.bf16.mxu1 %v421_v0 }
  0x17   :  { %392 = vmatpush3.bf16.msra.mxu0 %v417_v17 }
  0x18   :  { %374 = vmatpush3.bf16.msra.mxu1 %v410_v10  ;;  %393 = vmatprep.subr.bf16.mxu0 %v421_v0 }
  0x19   :  { %375 = vmatprep.subr.bf16.mxu1 %v421_v0 }
  0x1b   :  { %394 = vmatpush3.bf16.msra.mxu0 %v418_v18 }
  0x1c   :  { %376 = vmatpush3.bf16.msra.mxu1 %v411_v11  ;;  %395 = vmatprep.subr.bf16.mxu0 %v421_v0 }
  0x1d   :  { %377 = vmatprep.subr.bf16.mxu1 %v421_v0 }
  0x1f   :  { %396 = vmatpush3.bf16.msra.mxu0 %v419_v27 }
  0x20   :  { %378 = vmatpush3.bf16.msra.mxu1 %v412_v12  ;;  %397 = vmatprep.subr.bf16.mxu0 %v421_v0 }
  0x23   :  { %398 = vmatpush3.bf16.msra.mxu0 %v420_v28 }
  0xd9   :  { %v79_v20 = vpop.f32.mrb[0].mxu0 }
  0xda   :  { %v80_v21 = vadd.f32 %v317_v19, %v79_v20  ;;  %v361_v22 = vpop.f32.mrb[1].mxu0 }
  0xdb   :  { %v82_v23 = vpop.f32.mrb[2].mxu0 }
  0xdc   :  { %v85_v24 = vmax.f32 %v80_v21, 0.0  ;;  %v362_v25 = vpop.f32.mrb[3].mxu0 }
  0xde   :  { %v86_v26 = vpack.c.bf16 %v85_v24, %v85_v24 }
  0xe0   :  { %380 = vmatmul.mubr.bf16.vlgmr.msra.gmra.mrb[0].mxu1 %v86_v26 }
 0x1b3   :  { %v192_v30 = vpop.f32.mrb[0].mxu1 }
 0x1b4   :  { %v193_v31 = vadd.f32 %v319_v29, %v192_v30  ;;  %v381_v32 = vpop.f32.mrb[1].mxu1 }
 0x1b5   :  { %v195_v33 = vpop.f32.mrb[2].mxu1 }
 0x1b6   :  { %v198_v34 = vmax.f32 %v193_v31, 0.0  ;;  %v382_v35 = vpop.f32.mrb[3].mxu1 }
 0x1b8   :  { %v199_v36 = vpack.c.bf16 %v198_v34, %v198_v34 }
 0x1ba   :  { %400 = vmatmul.mubr.bf16.vlgmr.msra.gmra.mrb[4].mxu0 %v199_v36 }
 0x28d   :  { %v305_v38 = vpop.f32.mrb[4].mxu0 }
 0x28e   :  { %v306_v39 = vadd.f32 %v328_v37, %v305_v38  ;;  %v401_v40 = vpop.f32.mrb[5].mxu0 }
 0x28f   :  { %v308_v41 = vpop.f32.mrb[6].mxu0 }
 0x290   :  { %312 = vst.msk [vmem:[%s559_s7] sm:$0xff] %vm311_vm3, %v306_v39  ;;  %v402_v42 = vpop.f32.mrb[7].mxu0 }

</bundles_post_ra>
